<compile_context>
chip_gen: v7x
topology: tpu7x:2x2x1
jax: 0.10.0
libtpu: 0.0.40
codegen_flags: <defaults>
</compile_context>

<pallas_src>
import jax
import jax.numpy as jnp
from jax.experimental import pallas as pl
from jax.experimental.pallas import tpu as pltpu

H1 = 512   # hidden widths fixed by the module
H2 = 256


def _round_up(x, m):
    return (x + m - 1) // m * m


def _leaky_relu(x, slope=0.2):
    return jnp.where(x > 0, x, slope * x)


def discriminator_kernel(x_ref, w1_ref, b1_ref, w2_ref, b2_ref, w3_ref, b3_ref,
                         o_ref, h1_acc):
    """One TB-row batch tile; grid axis 1 tiles the C*H*W reduction of layer 1."""
    k = pl.program_id(1)

    @pl.when(k == 0)
    def _init():
        h1_acc[...] = jnp.zeros_like(h1_acc)

    # Layer 1 (K-tiled): bf16 operands, f32 accumulation on the MXU.
    h1_acc[...] += jnp.dot(x_ref[...], w1_ref[...],
                           preferred_element_type=jnp.float32)

    @pl.when(k == pl.num_programs(1) - 1)
    def _finalize():
        h1 = _leaky_relu(h1_acc[...] + b1_ref[...])              # (TB, 512) f32
        # Layer 2 on the MXU (bf16 operands, f32 accumulation).
        h2 = jnp.dot(h1.astype(jnp.bfloat16), w2_ref[...],
                     preferred_element_type=jnp.float32)
        h2 = _leaky_relu(h2 + b2_ref[...])                       # (TB, 256) f32
        # Layer 3 (256 -> 1) as a VPU broadcast-multiply + cross-lane reduce.
        h3 = jnp.sum(h2 * w3_ref[...], axis=-1, keepdims=True) + b3_ref[...]
        # Numerically-stable sigmoid; exp and the approximate reciprocal both
        # run on the (otherwise idle) EUP.
        z = jnp.exp(-jnp.abs(h3))
        inv = pl.reciprocal(1.0 + z, approx=True)
        sig = jnp.where(h3 >= 0, inv, z * inv)                   # (TB, 1)
        # Lane-dense store; the wrapper slices column 0.
        o_ref[...] = jnp.broadcast_to(sig, o_ref.shape)


def _discriminator_forward(img, params):
    """img: (B, C, H, W) float32 -> validity (B, 1) float32."""
    B = img.shape[0]
    x = img.reshape(B, -1).astype(jnp.float32)                   # torch .view(B, -1)
    D = x.shape[1]
    w1, b1, w2, b2, w3, b3 = params

    # Tile sizes: lane/sublane aligned, VMEM bounded regardless of D / B.
    TK = min(512, _round_up(D, 128))          # K tile of the layer-1 reduction
    TB = 256 if B > 256 else _round_up(B, 8)  # batch tile (>= 8 sublanes)
    D_pad = _round_up(D, TK)
    B_pad = _round_up(B, TB)
    n_b, n_k = B_pad // TB, D_pad // TK

    # Zero-pad (padded W1 rows are zero => no contribution) and cast only the
    # MXU operands to bf16; element-wise params stay f32.
    x_p = jnp.pad(x, ((0, B_pad - B), (0, D_pad - D))).astype(jnp.bfloat16)
    w1_p = jnp.pad(w1, ((0, D_pad - D), (0, 0))).astype(jnp.bfloat16)
    w2_b = w2.astype(jnp.bfloat16)
    w3_row = w3.reshape(1, H2).astype(jnp.float32)               # VPU dot-reduce
    b3_2d = b3.reshape(1, 1).astype(jnp.float32)

    grid_spec = pltpu.PrefetchScalarGridSpec(
        num_scalar_prefetch=0,
        grid=(n_b, n_k),                                         # (parallel, reduce)
        in_specs=[
            pl.BlockSpec((TB, TK), lambda i, k: (i, k)),         # x tile
            pl.BlockSpec((TK, H1), lambda i, k: (k, 0)),         # W1 K-slice
            pl.BlockSpec((1, H1), lambda i, k: (0, 0)),          # b1 (resident)
            pl.BlockSpec((H1, H2), lambda i, k: (0, 0)),         # W2 (resident)
            pl.BlockSpec((1, H2), lambda i, k: (0, 0)),          # b2
            pl.BlockSpec((1, H2), lambda i, k: (0, 0)),          # w3 row
            pl.BlockSpec((1, 1), lambda i, k: (0, 0)),           # b3
        ],
        out_specs=pl.BlockSpec((TB, 128), lambda i, k: (i, 0)),  # lane-dense slab
        scratch_shapes=[pltpu.VMEM((TB, H1), jnp.float32)],      # layer-1 accumulator
    )

    out = pl.pallas_call(
        discriminator_kernel,
        out_shape=jax.ShapeDtypeStruct((B_pad, 128), jnp.float32),
        grid_spec=grid_spec,
        compiler_params=pltpu.CompilerParams(
            dimension_semantics=("parallel", "arbitrary"),
            vmem_limit_bytes=32 * 1024 * 1024),
    )(x_p, w1_p, b1, w2_b, b2, w3_row, b3_2d)

    return out[:B, :1]


discriminator_forward = jax.jit(_discriminator_forward)


def init_params(key, in_features):
    """Deterministic init matching torch.nn.Linear default shapes.

    Weights are stored as (in, out) (transposed vs torch's (out, in)) and
    biases as (1, out) for clean broadcasting inside the kernel.
    """
    dims = [(in_features, H1), (H1, H2), (H2, 1)]
    params = []
    for fan_in, fan_out in dims:
        key, kw, kb = jax.random.split(key, 3)
        bound = 1.0 / (fan_in ** 0.5)
        w = jax.random.uniform(kw, (fan_in, fan_out), jnp.float32, -bound, bound)
        b = jax.random.uniform(kb, (1, fan_out), jnp.float32, -bound, bound)
        params += [w, b]
    return tuple(params)


def reference_forward(img, params, mxu_dtype=jnp.float32):
    """Pure-JAX reference. mxu_dtype=bfloat16 mirrors the kernel's MXU casts."""
    B = img.shape[0]
    x = img.reshape(B, -1).astype(jnp.float32)
    w1, b1, w2, b2, w3, b3 = params

    def linear(a, w, b):
        return jnp.dot(a.astype(mxu_dtype), w.astype(mxu_dtype),
                       preferred_element_type=jnp.float32) + b

    h1 = jax.nn.leaky_relu(linear(x, w1, b1), 0.2)
    h2 = jax.nn.leaky_relu(linear(h1, w2, b2), 0.2)
    h3 = h2 @ w3 + b3                        # final layer stays f32 (as in kernel)
    return jax.nn.sigmoid(h3)


if __name__ == "__main__":
    # Small shapes consistent with the module: img_shape = (C, H, W)
    B, C, H, W = 2, 4, 16, 16
    in_features = C * H * W                  # 1024

    key = jax.random.PRNGKey(0)
    key, kimg = jax.random.split(key)
    img = jax.random.normal(kimg, (B, C, H, W), jnp.float32)
    params = init_params(key, in_features)

    validity = jax.block_until_ready(discriminator_forward(img, params))
    assert validity.shape == (B, 1), validity.shape

    # Tight check vs a reference that mirrors the kernel's bf16 MXU numerics.
    ref_bf16 = reference_forward(img, params, mxu_dtype=jnp.bfloat16)
    assert jnp.allclose(validity, ref_bf16, atol=2e-3, rtol=2e-3), (
        "mismatch vs bf16-mirrored reference, max abs diff = "
        + str(float(jnp.max(jnp.abs(validity - ref_bf16)))))

    # Looser sanity check vs the pure-f32 (PyTorch-equivalent) reference.
    ref_f32 = reference_forward(img, params, mxu_dtype=jnp.float32)
    assert jnp.allclose(validity, ref_f32, atol=5e-2, rtol=5e-2), (
        "mismatch vs f32 reference, max abs diff = "
        + str(float(jnp.max(jnp.abs(validity - ref_f32)))))

    print("KERNEL_OK")
</pallas_src>

<mosaic_0001>
module attributes {stable_mosaic.version = 11 : i64} {
  func.func @discriminator_kernel(%arg0: i32, %arg1: i32, %arg2: memref<8x512xbf16, #tpu.memory_space<vmem>>, %arg3: memref<512x512xbf16, #tpu.memory_space<vmem>>, %arg4: memref<1x512xf32, #tpu.memory_space<vmem>>, %arg5: memref<512x256xbf16, #tpu.memory_space<vmem>>, %arg6: memref<1x256xf32, #tpu.memory_space<vmem>>, %arg7: memref<1x256xf32, #tpu.memory_space<vmem>>, %arg8: memref<1x1xf32, #tpu.memory_space<vmem>>, %arg9: memref<8x128xf32, #tpu.memory_space<vmem>>, %arg10: memref<8x512xf32, #tpu.memory_space<vmem>>) attributes {dimension_semantics = [#tpu.dimension_semantics<parallel>, #tpu.dimension_semantics<arbitrary>], iteration_bounds = array<i64: 1, 2>, scalar_prefetch = 0 : i64, scratch_operands = 1 : i64, tpu.core_type = #tpu.core_type<tc>, window_params = [{transform_indices = @transform_0, window_bounds = array<i64: 8, 512>}, {transform_indices = @transform_1, window_bounds = array<i64: 512, 512>}, {pipeline_mode = #tpu.pipeline_mode<synchronous>, transform_indices = @transform_2, window_bounds = array<i64: 1, 512>}, {pipeline_mode = #tpu.pipeline_mode<synchronous>, transform_indices = @transform_3, window_bounds = array<i64: 512, 256>}, {pipeline_mode = #tpu.pipeline_mode<synchronous>, transform_indices = @transform_4, window_bounds = array<i64: 1, 256>}, {pipeline_mode = #tpu.pipeline_mode<synchronous>, transform_indices = @transform_5, window_bounds = array<i64: 1, 256>}, {pipeline_mode = #tpu.pipeline_mode<synchronous>, transform_indices = @transform_6, window_bounds = array<i64: 1, 1>}, {transform_indices = @transform_7, window_bounds = array<i64: 8, 128>}]} {
    %c0_i32 = arith.constant 0 : i32
    %0 = arith.cmpi eq, %arg1, %c0_i32 : i32
    %1 = arith.extui %0 : i1 to i32
    %c0_i32_0 = arith.constant 0 : i32
    %2 = arith.cmpi ne, %1, %c0_i32_0 : i32
    scf.if %2 {
      %cst_9 = arith.constant 0.000000e+00 : f32
      %12 = vector.broadcast %cst_9 : f32 to vector<8x512xf32>
      %c0_10 = arith.constant 0 : index
      %c0_11 = arith.constant 0 : index
      %13 = vector.load %arg10[%c0_10, %c0_11] : memref<8x512xf32, #tpu.memory_space<vmem>>, vector<8x512xf32>
      tpu.vector_store %arg10[%c0_10, %c0_11], %12 {strides = array<i32>} : memref<8x512xf32, #tpu.memory_space<vmem>>, vector<8x512xf32>,
    } else {
    }
    %c0 = arith.constant 0 : index
    %c0_1 = arith.constant 0 : index
    %3 = vector.load %arg10[%c0, %c0_1] : memref<8x512xf32, #tpu.memory_space<vmem>>, vector<8x512xf32>
    %c0_2 = arith.constant 0 : index
    %c0_3 = arith.constant 0 : index
    %4 = vector.load %arg2[%c0_2, %c0_3] : memref<8x512xbf16, #tpu.memory_space<vmem>>, vector<8x512xbf16>
    %c0_4 = arith.constant 0 : index
    %c0_5 = arith.constant 0 : index
    %5 = vector.load %arg3[%c0_4, %c0_5] : memref<512x512xbf16, #tpu.memory_space<vmem>>, vector<512x512xbf16>
    %cst = arith.constant dense<0.000000e+00> : vector<8x512xf32>
    %6 = tpu.matmul %4, %5, %cst {dimension_numbers = #tpu.dot_dimension_numbers<[1], [0], [0], [1], [0, 0, 1, 1], [], []>} : vector<8x512xbf16>, vector<512x512xbf16>, vector<8x512xf32> -> vector<8x512xf32>
    %7 = arith.addf %3, %6 : vector<8x512xf32>
    %c0_6 = arith.constant 0 : index
    %c0_7 = arith.constant 0 : index
    %8 = vector.load %arg10[%c0_6, %c0_7] : memref<8x512xf32, #tpu.memory_space<vmem>>, vector<8x512xf32>
    tpu.vector_store %arg10[%c0_6, %c0_7], %7 {strides = array<i32>} : memref<8x512xf32, #tpu.memory_space<vmem>>, vector<8x512xf32>,
    %c1_i32 = arith.constant 1 : i32
    %9 = arith.cmpi eq, %arg1, %c1_i32 : i32
    %10 = arith.extui %9 : i1 to i32
    %c0_i32_8 = arith.constant 0 : i32
    %11 = arith.cmpi ne, %10, %c0_i32_8 : i32
    scf.if %11 {
      %c0_9 = arith.constant 0 : index
      %c0_10 = arith.constant 0 : index
      %12 = vector.load %arg10[%c0_9, %c0_10] : memref<8x512xf32, #tpu.memory_space<vmem>>, vector<8x512xf32>
      %c0_11 = arith.constant 0 : index
      %c0_12 = arith.constant 0 : index
      %13 = vector.load %arg4[%c0_11, %c0_12] : memref<1x512xf32, #tpu.memory_space<vmem>>, vector<1x512xf32>
      %14 = vector.broadcast %13 : vector<1x512xf32> to vector<8x512xf32>
      %15 = arith.addf %12, %14 : vector<8x512xf32>
      %cst_13 = arith.constant 0.000000e+00 : f32
      %16 = vector.broadcast %cst_13 : f32 to vector<8x512xf32>
      %17 = arith.cmpf ogt, %15, %16 : vector<8x512xf32>
      %cst_14 = arith.constant 2.000000e-01 : f32
      %18 = vector.broadcast %cst_14 : f32 to vector<8x512xf32>
      %19 = arith.mulf %18, %15 : vector<8x512xf32>
      %20 = arith.select %17, %15, %19 : vector<8x512xi1>, vector<8x512xf32>
      %21 = arith.truncf %20 : vector<8x512xf32> to vector<8x512xbf16>
      %c0_15 = arith.constant 0 : index
      %c0_16 = arith.constant 0 : index
      %22 = vector.load %arg5[%c0_15, %c0_16] : memref<512x256xbf16, #tpu.memory_space<vmem>>, vector<512x256xbf16>
      %cst_17 = arith.constant dense<0.000000e+00> : vector<8x256xf32>
      %23 = tpu.matmul %21, %22, %cst_17 {dimension_numbers = #tpu.dot_dimension_numbers<[1], [0], [0], [1], [0, 0, 1, 1], [], []>} : vector<8x512xbf16>, vector<512x256xbf16>, vector<8x256xf32> -> vector<8x256xf32>
      %c0_18 = arith.constant 0 : index
      %c0_19 = arith.constant 0 : index
      %24 = vector.load %arg6[%c0_18, %c0_19] : memref<1x256xf32, #tpu.memory_space<vmem>>, vector<1x256xf32>
      %25 = vector.broadcast %24 : vector<1x256xf32> to vector<8x256xf32>
      %26 = arith.addf %23, %25 : vector<8x256xf32>
      %cst_20 = arith.constant 0.000000e+00 : f32
      %27 = vector.broadcast %cst_20 : f32 to vector<8x256xf32>
      %28 = arith.cmpf ogt, %26, %27 : vector<8x256xf32>
      %cst_21 = arith.constant 2.000000e-01 : f32
      %29 = vector.broadcast %cst_21 : f32 to vector<8x256xf32>
      %30 = arith.mulf %29, %26 : vector<8x256xf32>
      %31 = arith.select %28, %26, %30 : vector<8x256xi1>, vector<8x256xf32>
      %c0_22 = arith.constant 0 : index
      %c0_23 = arith.constant 0 : index
      %32 = vector.load %arg7[%c0_22, %c0_23] : memref<1x256xf32, #tpu.memory_space<vmem>>, vector<1x256xf32>
      %33 = vector.broadcast %32 : vector<1x256xf32> to vector<8x256xf32>
      %34 = arith.mulf %31, %33 : vector<8x256xf32>
      %cst_24 = arith.constant dense<0.000000e+00> : vector<8xf32>
      %35 = vector.multi_reduction <add>, %34, %cst_24 [1] : vector<8x256xf32> to vector<8xf32>
      %36 = vector.shape_cast %35 : vector<8xf32> to vector<8x1xf32>
      %c0_25 = arith.constant 0 : index
      %c0_26 = arith.constant 0 : index
      %37 = vector.load %arg8[%c0_25, %c0_26] : memref<1x1xf32, #tpu.memory_space<vmem>>, vector<1x1xf32>
      %38 = vector.broadcast %37 : vector<1x1xf32> to vector<8x1xf32>
      %39 = arith.addf %36, %38 : vector<8x1xf32>
      %40 = math.absf %39 : vector<8x1xf32>
      %cst_27 = arith.constant 0.000000e+00 : f32
      %41 = vector.broadcast %cst_27 : f32 to vector<8x1xf32>
      %42 = arith.subf %41, %40 : vector<8x1xf32>
      %43 = math.exp %42 : vector<8x1xf32>
      %cst_28 = arith.constant 1.000000e+00 : f32
      %44 = vector.broadcast %cst_28 : f32 to vector<8x1xf32>
      %45 = arith.addf %44, %43 : vector<8x1xf32>
      %46 = tpu.reciprocal %45 {approx = true} : vector<8x1xf32> -> vector<8x1xf32>
      %cst_29 = arith.constant 0.000000e+00 : f32
      %47 = vector.broadcast %cst_29 : f32 to vector<8x1xf32>
      %48 = arith.cmpf oge, %39, %47 : vector<8x1xf32>
      %49 = arith.mulf %43, %46 : vector<8x1xf32>
      %50 = arith.select %48, %46, %49 : vector<8x1xi1>, vector<8x1xf32>
      %51 = vector.shape_cast %50 : vector<8x1xf32> to vector<8x1xf32>
      %52 = vector.broadcast %51 : vector<8x1xf32> to vector<8x128xf32>
      %c0_30 = arith.constant 0 : index
      %c0_31 = arith.constant 0 : index
      %53 = vector.load %arg9[%c0_30, %c0_31] : memref<8x128xf32, #tpu.memory_space<vmem>>, vector<8x128xf32>
      tpu.vector_store %arg9[%c0_30, %c0_31], %52 {strides = array<i32>} : memref<8x128xf32, #tpu.memory_space<vmem>>, vector<8x128xf32>,
    } else {
    }
    return
  }
  func.func @transform_0(%arg0: i32, %arg1: i32) -> (i32, i32) {
    %c0_i32 = arith.constant 0 : i32
    return %arg0, %arg1 : i32, i32
  }
  func.func @transform_1(%arg0: i32, %arg1: i32) -> (i32, i32) {
    %c0_i32 = arith.constant 0 : i32
    %c0_i32_0 = arith.constant 0 : i32
    return %arg1, %c0_i32 : i32, i32
  }
  func.func @transform_2(%arg0: i32, %arg1: i32) -> (i32, i32) {
    %c0_i32 = arith.constant 0 : i32
    %c0_i32_0 = arith.constant 0 : i32
    %c0_i32_1 = arith.constant 0 : i32
    return %c0_i32, %c0_i32_0 : i32, i32
  }
  func.func @transform_3(%arg0: i32, %arg1: i32) -> (i32, i32) {
    %c0_i32 = arith.constant 0 : i32
    %c0_i32_0 = arith.constant 0 : i32
    %c0_i32_1 = arith.constant 0 : i32
    return %c0_i32, %c0_i32_0 : i32, i32
  }
  func.func @transform_4(%arg0: i32, %arg1: i32) -> (i32, i32) {
    %c0_i32 = arith.constant 0 : i32
    %c0_i32_0 = arith.constant 0 : i32
    %c0_i32_1 = arith.constant 0 : i32
    return %c0_i32, %c0_i32_0 : i32, i32
  }
  func.func @transform_5(%arg0: i32, %arg1: i32) -> (i32, i32) {
    %c0_i32 = arith.constant 0 : i32
    %c0_i32_0 = arith.constant 0 : i32
    %c0_i32_1 = arith.constant 0 : i32
    return %c0_i32, %c0_i32_0 : i32, i32
  }
  func.func @transform_6(%arg0: i32, %arg1: i32) -> (i32, i32) {
    %c0_i32 = arith.constant 0 : i32
    %c0_i32_0 = arith.constant 0 : i32
    %c0_i32_1 = arith.constant 0 : i32
    return %c0_i32, %c0_i32_0 : i32, i32
  }
  func.func @transform_7(%arg0: i32, %arg1: i32) -> (i32, i32) {
    %c0_i32 = arith.constant 0 : i32
    %c0_i32_0 = arith.constant 0 : i32
    return %arg0, %c0_i32 : i32, i32
  }
}

</mosaic_0001>

<bundles_post_ra>
// kernel: _discriminator_forward.1
= control target key start
LH: loop header
LB: loop body
LE: loop exit
PB: predicated region body
PF: predicated region fallthrough
CT: control target
= control target key end

     0   :  { %s2559_s26 = smov 0   ;;  %s2561_s27 = smov 0   ;;  %s2958_s0 = inlined_call_operand.vmem [shape: bf16[8,1024], index: 0, kind: input, shape index: {}]   ;;  %s2959_s1 = inlined_call_operand.vmem [shape: bf16[1024,512], index: 1, kind: input, shape index: {}]   ;;  %s2960_s2 = inlined_call_operand.vmem [shape: f32[1,512], index: 2, kind: input, shape index: {}]   ;;  %s2961_s3 = inlined_call_operand.vmem [shape: bf16[512,256], index: 3, kind: input, shape index: {}]   ;;  %s2962_s4 = inlined_call_operand.vmem [shape: f32[1,256], index: 4, kind: input, shape index: {}]   ;;  %s2963_s5 = inlined_call_operand.vmem [shape: f32[1,256], index: 5, kind: input, shape index: {}]   ;;  %s2964_s6 = inlined_call_operand.<no memory space> [shape: f32[1,1], index: 6, kind: input, shape index: {}]   ;;  %s2965_s7 = inlined_call_operand.vmem [shape: f32[8,128], index: 7, kind: output, shape index: {}]  }
   0x1   :  { %v12_v0 = vstv %s2964_s6  ;;  %s2563_s28 = smov 0  }
   0x2   :  { %13 = vst [vmem:[#allocation3] sm:$0x1] %v12_v0 }
   0x3 LB: > { %s28_s6 = sadd.s32 1, %s2508_s27  ;;  %p1954_p0 = scmp.ge.s32.totalorder %s2512_s28, 1  ;;  %s2512_s28 = sphi %s2563_s28, %s19_s28   ;;  %s2508_s27 = sphi %s2561_s27, %s2967_s27   ;;  %s2504_s26 = sphi %s2559_s26, %s2966_s26  }
   0x4   : > { %p29_p1 = scmp.ge.s32.totalorder %s28_s6, 2  ;;  %p270_p2 = scmp.lt.s32.totalorder %s2512_s28, 3 }
   0x6   : > { %s2969_s6 = smov (%p29_p1, %s28_s6), 0  ;;  %p271_p3 = pnand %p1954_p0, %p270_p2 }
   0x7   : > { %s1955_s29 = sshll.u32 (!%p271_p3), %s2504_s26, 2  ;;  %s1957_s30 = sshll.u32 (!%p271_p3), %s2504_s26, 6 }
   0x8   : > { %274 = sbr.rel (%p271_p3) target bundleno = 920 (0x398), region = 48  ;;  %p314_p4 = scmp.lt.s32.totalorder (!%p271_p3), %s1955_s29, 7 }
   0x9   : > { %p322_p5 = scmp.lt.s32.totalorder (!%p271_p3), %s1957_s30, 127  ;;  %p1960_p6 = scmp.ne.s32.totalorder (!%p271_p3), %s2504_s26, 0 }
   0xf   : > { %s2971_s29 = smov (!%p314_p4, %s1955_s29), 7  ;;  %s2973_s30 = smov (!%p322_p5, %s1957_s30), 127 }
  0x10   : > { %s1956_s8 = sshll.u32 %s2971_s29, 2  ;;  %s2162_s12 = sshll.u32 %s2973_s30, 4  ;;  %v2514_v1 = vmov (!%p1960_p6), 0.0  }
  0x11   : > { %s2584_s11 = scalar_lea.vmem %s2958_s0, %s1956_s8  ;;  %s2589_s15 = scalar_lea.vmem %s2959_s1, %s2162_s12  ;;  %336 = vst [vmem:[#allocation2] sm:$0xff] (!%p1960_p6), %v2514_v1  ;;  %337 = vst [vmem:[#allocation2 + $0x8] sm:$0xff] (!%p1960_p6), %v2514_v1 }
  0x12   : > { %335 = sbr.rel (%p1960_p6) target bundleno = 25 (0x19), region = 52  ;;  %338 = vst [vmem:[#allocation2 + $0x10] sm:$0xff] (!%p1960_p6), %v2514_v1  ;;  %339 = vst [vmem:[#allocation2 + $0x18] sm:$0xff] (!%p1960_p6), %v2514_v1 }
  0x19 PF: > { %v2193_v2 = vld [vmem:[%s2589_s15 + $0x4] ss:$16 sps:$4 sm:$0xff]   ;;  %v2197_v4 = vld [vmem:[%s2589_s15] ss:$16 sps:$4 sm:$0xff]   ;;  %v345_v50 = vld [vmem:[%s2584_s11 + $0x8] sm:$0xff]  ;;  %p2093_p7 = scmp.ne.s32.totalorder %s2504_s26, 1 }
  0x1a   : > { %v2195_v3 = vld [vmem:[%s2589_s15 + $0x204] ss:$16 sps:$4 sm:$0xff]   ;;  %1128 = vmatprep.subr.bf16.mxu0 %v2193_v2  ;;  %v2198_v5 = vld [vmem:[%s2589_s15 + $0x200] ss:$16 sps:$4 sm:$0xff]   ;;  %v1964_v53 = vcombine.high %v345_v50, %v345_v50 }
  0x1b   : > { %1169 = vmatprep.subr.bf16.mxu1 %v2195_v3  ;;  %v2199_v6 = vld [vmem:[%s2589_s15 + $0x24] ss:$16 sps:$4 sm:$0xff]   ;;  %1129 = vmatpush1.bf16.msra.mxu0 %v2197_v4  ;;  %v2203_v8 = vld [vmem:[%s2589_s15 + $0x20] ss:$16 sps:$4 sm:$0xff]  }
  0x1c   : > { %1170 = vmatpush1.bf16.msra.mxu1 %v2198_v5  ;;  %v2201_v7 = vld [vmem:[%s2589_s15 + $0x224] ss:$16 sps:$4 sm:$0xff]   ;;  %1130 = vmatprep.subr.bf16.mxu0 %v2199_v6  ;;  %v2204_v9 = vld [vmem:[%s2589_s15 + $0x220] ss:$16 sps:$4 sm:$0xff]   ;;  %v2295_v6 = vld [vmem:[%s2589_s15 + $0xc] ss:$16 sps:$4 sm:$0xff]  }
  0x1d   : > { %1171 = vmatprep.subr.bf16.mxu1 %v2201_v7  ;;  %v2205_v10 = vld [vmem:[%s2589_s15 + $0x44] ss:$16 sps:$4 sm:$0xff]   ;;  %v2209_v12 = vld [vmem:[%s2589_s15 + $0x40] ss:$16 sps:$4 sm:$0xff]   ;;  %1201 = vmatprep.mubr.bf16.mxu1 %v1964_v53  ;;  %v2298_v7 = vld [vmem:[%s2589_s15 + $0x20c] ss:$16 sps:$4 sm:$0xff]  }
  0x1e   : > { %v2207_v11 = vld [vmem:[%s2589_s15 + $0x244] ss:$16 sps:$4 sm:$0xff]   ;;  %v2210_v13 = vld [vmem:[%s2589_s15 + $0x240] ss:$16 sps:$4 sm:$0xff]  }
  0x1f   : > { %1131 = vmatpush1.bf16.msra.mxu0 %v2203_v8  ;;  %v2211_v14 = vld [vmem:[%s2589_s15 + $0x64] ss:$16 sps:$4 sm:$0xff]   ;;  %v2215_v16 = vld [vmem:[%s2589_s15 + $0x60] ss:$16 sps:$4 sm:$0xff]  }
  0x20   : > { %1172 = vmatpush1.bf16.msra.mxu1 %v2204_v9  ;;  %1132 = vmatprep.subr.bf16.mxu0 %v2205_v10  ;;  %v2213_v15 = vld [vmem:[%s2589_s15 + $0x264] ss:$16 sps:$4 sm:$0xff]   ;;  %v2216_v17 = vld [vmem:[%s2589_s15 + $0x260] ss:$16 sps:$4 sm:$0xff]   ;;  %v2665_v9 = vcombine.low %v345_v50, %v345_v50  ;;  %v2293_v10 = vld [vmem:[%s2589_s15 + $0x8] ss:$16 sps:$4 sm:$0xff]  }
  0x21   : > { %1173 = vmatprep.subr.bf16.mxu1 %v2207_v11  ;;  %v2217_v18 = vld [vmem:[%s2589_s15 + $0x84] ss:$16 sps:$4 sm:$0xff]   ;;  %v2221_v20 = vld [vmem:[%s2589_s15 + $0x80] ss:$16 sps:$4 sm:$0xff]   ;;  %v2296_v11 = vld [vmem:[%s2589_s15 + $0x208] ss:$16 sps:$4 sm:$0xff]  }
  0x22   : > { %v2219_v19 = vld [vmem:[%s2589_s15 + $0x284] ss:$16 sps:$4 sm:$0xff]   ;;  %v2222_v21 = vld [vmem:[%s2589_s15 + $0x280] ss:$16 sps:$4 sm:$0xff]   ;;  %v2353_v50 = vld [vmem:[%s2589_s15 + $0x148] ss:$16 sps:$4 sm:$0xff]  }
  0x23   : > { %1133 = vmatpush1.bf16.msra.mxu0 %v2209_v12  ;;  %v2223_v22 = vld [vmem:[%s2589_s15 + $0xa4] ss:$16 sps:$4 sm:$0xff]   ;;  %v2227_v24 = vld [vmem:[%s2589_s15 + $0xa0] ss:$16 sps:$4 sm:$0xff]   ;;  %v2301_v12 = vld [vmem:[%s2589_s15 + $0x2c] ss:$16 sps:$4 sm:$0xff]  }
  0x24   : > { %1174 = vmatpush1.bf16.msra.mxu1 %v2210_v13  ;;  %1134 = vmatprep.subr.bf16.mxu0 %v2211_v14  ;;  %v2225_v23 = vld [vmem:[%s2589_s15 + $0x2a4] ss:$16 sps:$4 sm:$0xff]   ;;  %v2228_v25 = vld [vmem:[%s2589_s15 + $0x2a0] ss:$16 sps:$4 sm:$0xff]   ;;  %v2304_v13 = vld [vmem:[%s2589_s15 + $0x22c] ss:$16 sps:$4 sm:$0xff]  }
  0x25   : > { %1175 = vmatprep.subr.bf16.mxu1 %v2213_v15  ;;  %v2229_v26 = vld [vmem:[%s2589_s15 + $0xc4] ss:$16 sps:$4 sm:$0xff]   ;;  %v2233_v28 = vld [vmem:[%s2589_s15 + $0xc0] ss:$16 sps:$4 sm:$0xff]   ;;  %v2299_v14 = vld [vmem:[%s2589_s15 + $0x28] ss:$16 sps:$4 sm:$0xff]  }
  0x26   : > { %v2231_v27 = vld [vmem:[%s2589_s15 + $0x2c4] ss:$16 sps:$4 sm:$0xff]   ;;  %v2234_v29 = vld [vmem:[%s2589_s15 + $0x2c0] ss:$16 sps:$4 sm:$0xff]   ;;  %v2302_v15 = vld [vmem:[%s2589_s15 + $0x228] ss:$16 sps:$4 sm:$0xff]  }
  0x27   : > { %1135 = vmatpush1.bf16.msra.mxu0 %v2215_v16  ;;  %v2235_v30 = vld [vmem:[%s2589_s15 + $0xe4] ss:$16 sps:$4 sm:$0xff]   ;;  %v2239_v32 = vld [vmem:[%s2589_s15 + $0xe0] ss:$16 sps:$4 sm:$0xff]   ;;  %v2307_v16 = vld [vmem:[%s2589_s15 + $0x4c] ss:$16 sps:$4 sm:$0xff]  }
  0x28   : > { %1176 = vmatpush1.bf16.msra.mxu1 %v2216_v17  ;;  %1136 = vmatprep.subr.bf16.mxu0 %v2217_v18  ;;  %v2237_v31 = vld [vmem:[%s2589_s15 + $0x2e4] ss:$16 sps:$4 sm:$0xff]   ;;  %v2240_v33 = vld [vmem:[%s2589_s15 + $0x2e0] ss:$16 sps:$4 sm:$0xff]   ;;  %v2310_v17 = vld [vmem:[%s2589_s15 + $0x24c] ss:$16 sps:$4 sm:$0xff]  }
  0x29   : > { %1177 = vmatprep.subr.bf16.mxu1 %v2219_v19  ;;  %v2241_v34 = vld [vmem:[%s2589_s15 + $0x104] ss:$16 sps:$4 sm:$0xff]   ;;  %v2245_v36 = vld [vmem:[%s2589_s15 + $0x100] ss:$16 sps:$4 sm:$0xff]   ;;  %v2305_v18 = vld [vmem:[%s2589_s15 + $0x48] ss:$16 sps:$4 sm:$0xff]  }
  0x2a   : > { %v2243_v35 = vld [vmem:[%s2589_s15 + $0x304] ss:$16 sps:$4 sm:$0xff]   ;;  %v2246_v37 = vld [vmem:[%s2589_s15 + $0x300] ss:$16 sps:$4 sm:$0xff]   ;;  %v2308_v19 = vld [vmem:[%s2589_s15 + $0x248] ss:$16 sps:$4 sm:$0xff]  }
  0x2b   : > { %1137 = vmatpush1.bf16.msra.mxu0 %v2221_v20  ;;  %v2247_v38 = vld [vmem:[%s2589_s15 + $0x124] ss:$16 sps:$4 sm:$0xff]   ;;  %v2251_v40 = vld [vmem:[%s2589_s15 + $0x120] ss:$16 sps:$4 sm:$0xff]   ;;  %v2313_v20 = vld [vmem:[%s2589_s15 + $0x6c] ss:$16 sps:$4 sm:$0xff]  }
  0x2c   : > { %1178 = vmatpush1.bf16.msra.mxu1 %v2222_v21  ;;  %1138 = vmatprep.subr.bf16.mxu0 %v2223_v22  ;;  %v2249_v39 = vld [vmem:[%s2589_s15 + $0x324] ss:$16 sps:$4 sm:$0xff]   ;;  %v2252_v41 = vld [vmem:[%s2589_s15 + $0x320] ss:$16 sps:$4 sm:$0xff]   ;;  %v2316_v21 = vld [vmem:[%s2589_s15 + $0x26c] ss:$16 sps:$4 sm:$0xff]  }
  0x2d   : > { %1179 = vmatprep.subr.bf16.mxu1 %v2225_v23  ;;  %v2253_v42 = vld [vmem:[%s2589_s15 + $0x144] ss:$16 sps:$4 sm:$0xff]   ;;  %v2257_v44 = vld [vmem:[%s2589_s15 + $0x140] ss:$16 sps:$4 sm:$0xff]   ;;  %v2311_v22 = vld [vmem:[%s2589_s15 + $0x68] ss:$16 sps:$4 sm:$0xff]  }
  0x2e   : > { %v2255_v43 = vld [vmem:[%s2589_s15 + $0x344] ss:$16 sps:$4 sm:$0xff]   ;;  %v2258_v45 = vld [vmem:[%s2589_s15 + $0x340] ss:$16 sps:$4 sm:$0xff]   ;;  %v2314_v23 = vld [vmem:[%s2589_s15 + $0x268] ss:$16 sps:$4 sm:$0xff]  }
  0x2f   : > { %1139 = vmatpush1.bf16.msra.mxu0 %v2227_v24  ;;  %v2259_v46 = vld [vmem:[%s2589_s15 + $0x164] ss:$16 sps:$4 sm:$0xff]   ;;  %v2263_v51 = vld [vmem:[%s2589_s15 + $0x160] ss:$16 sps:$4 sm:$0xff]   ;;  %v2319_v24 = vld [vmem:[%s2589_s15 + $0x8c] ss:$16 sps:$4 sm:$0xff]  }
  0x30   : > { %1180 = vmatpush1.bf16.msra.mxu1 %v2228_v25  ;;  %1140 = vmatprep.subr.bf16.mxu0 %v2229_v26  ;;  %v2261_v47 = vld [vmem:[%s2589_s15 + $0x364] ss:$16 sps:$4 sm:$0xff]   ;;  %v2264_v52 = vld [vmem:[%s2589_s15 + $0x360] ss:$16 sps:$4 sm:$0xff]   ;;  %v2322_v25 = vld [vmem:[%s2589_s15 + $0x28c] ss:$16 sps:$4 sm:$0xff]  }
  0x31   : > { %1181 = vmatprep.subr.bf16.mxu1 %v2231_v27  ;;  %v344_v48 = vld [vmem:[%s2584_s11] sm:$0xff]  ;;  %v2317_v26 = vld [vmem:[%s2589_s15 + $0x88] ss:$16 sps:$4 sm:$0xff]  }
  0x32   : > { %v2639_v49 = vcombine.high %v344_v48, %v344_v48  ;;  %v2265_v54 = vld [vmem:[%s2589_s15 + $0x184] ss:$16 sps:$4 sm:$0xff]   ;;  %v2269_v56 = vld [vmem:[%s2589_s15 + $0x180] ss:$16 sps:$4 sm:$0xff]   ;;  %v2663_v8 = vcombine.low %v344_v48, %v344_v48  ;;  %v2320_v27 = vld [vmem:[%s2589_s15 + $0x288] ss:$16 sps:$4 sm:$0xff]  }
  0x33   : > { %1141 = vmatpush1.bf16.msra.mxu0 %v2233_v28  ;;  %v2267_v55 = vld [vmem:[%s2589_s15 + $0x384] ss:$16 sps:$4 sm:$0xff]   ;;  %v2270_v57 = vld [vmem:[%s2589_s15 + $0x380] ss:$16 sps:$4 sm:$0xff]   ;;  %v2325_v28 = vld [vmem:[%s2589_s15 + $0xac] ss:$16 sps:$4 sm:$0xff]  }
  0x34   : > { %1182 = vmatpush1.bf16.msra.mxu1 %v2234_v29  ;;  %1142 = vmatprep.subr.bf16.mxu0 %v2235_v30  ;;  %v2271_v58 = vld [vmem:[%s2589_s15 + $0x1a4] ss:$16 sps:$4 sm:$0xff]   ;;  %v2275_v60 = vld [vmem:[%s2589_s15 + $0x1a0] ss:$16 sps:$4 sm:$0xff]   ;;  %v2328_v29 = vld [vmem:[%s2589_s15 + $0x2ac] ss:$16 sps:$4 sm:$0xff]  }
  0x35   : > { %1183 = vmatprep.subr.bf16.mxu1 %v2237_v31  ;;  %1160 = vmatprep.mubr.bf16.mxu0 %v2639_v49  ;;  %v2273_v59 = vld [vmem:[%s2589_s15 + $0x3a4] ss:$16 sps:$4 sm:$0xff]   ;;  %v2276_v61 = vld [vmem:[%s2589_s15 + $0x3a0] ss:$16 sps:$4 sm:$0xff]   ;;  %v2323_v30 = vld [vmem:[%s2589_s15 + $0xa8] ss:$16 sps:$4 sm:$0xff]  }
  0x36   : > { %v2277_v62 = vld [vmem:[%s2589_s15 + $0x1c4] ss:$16 sps:$4 sm:$0xff]   ;;  %v2281_v0 = vld [vmem:[%s2589_s15 + $0x1c0] ss:$16 sps:$4 sm:$0xff]   ;;  %v2326_v31 = vld [vmem:[%s2589_s15 + $0x2a8] ss:$16 sps:$4 sm:$0xff]  }
  0x37   : > { %1143 = vmatpush1.bf16.msra.mxu0 %v2239_v32  ;;  %v2279_v63 = vld [vmem:[%s2589_s15 + $0x3c4] ss:$16 sps:$4 sm:$0xff]   ;;  %v2282_v1 = vld [vmem:[%s2589_s15 + $0x3c0] ss:$16 sps:$4 sm:$0xff]   ;;  %v2331_v32 = vld [vmem:[%s2589_s15 + $0xcc] ss:$16 sps:$4 sm:$0xff]  }
  0x38   : > { %1184 = vmatpush1.bf16.msra.mxu1 %v2240_v33  ;;  %1144 = vmatprep.subr.bf16.mxu0 %v2241_v34  ;;  %v2283_v2 = vld [vmem:[%s2589_s15 + $0x1e4] ss:$16 sps:$4 sm:$0xff]   ;;  %v2287_v4 = vld [vmem:[%s2589_s15 + $0x1e0] ss:$16 sps:$4 sm:$0xff]   ;;  %v2334_v33 = vld [vmem:[%s2589_s15 + $0x2cc] ss:$16 sps:$4 sm:$0xff]  }
  0x39   : > { %1185 = vmatprep.subr.bf16.mxu1 %v2243_v35  ;;  %v2285_v3 = vld [vmem:[%s2589_s15 + $0x3e4] ss:$16 sps:$4 sm:$0xff]   ;;  %v2288_v5 = vld [vmem:[%s2589_s15 + $0x3e0] ss:$16 sps:$4 sm:$0xff]   ;;  %v2329_v34 = vld [vmem:[%s2589_s15 + $0xc8] ss:$16 sps:$4 sm:$0xff]  }
  0x3a   : > { %v2332_v35 = vld [vmem:[%s2589_s15 + $0x2c8] ss:$16 sps:$4 sm:$0xff]   ;;  %v2355_v48 = vld [vmem:[%s2589_s15 + $0x14c] ss:$16 sps:$4 sm:$0xff]  }
  0x3b   : > { %1145 = vmatpush1.bf16.msra.mxu0 %v2245_v36  ;;  %v2337_v36 = vld [vmem:[%s2589_s15 + $0xec] ss:$16 sps:$4 sm:$0xff]  }
  0x3c   : > { %1186 = vmatpush1.bf16.msra.mxu1 %v2246_v37  ;;  %1146 = vmatprep.subr.bf16.mxu0 %v2247_v38  ;;  %v2340_v37 = vld [vmem:[%s2589_s15 + $0x2ec] ss:$16 sps:$4 sm:$0xff]   ;;  %v2335_v38 = vld [vmem:[%s2589_s15 + $0xe8] ss:$16 sps:$4 sm:$0xff]  }
  0x3d   : > { %1187 = vmatprep.subr.bf16.mxu1 %v2249_v39  ;;  %v2338_v39 = vld [vmem:[%s2589_s15 + $0x2e8] ss:$16 sps:$4 sm:$0xff]  }
  0x3f   : > { %1147 = vmatpush1.bf16.msra.mxu0 %v2251_v40  ;;  %v2343_v40 = vld [vmem:[%s2589_s15 + $0x10c] ss:$16 sps:$4 sm:$0xff]  }
  0x40   : > { %1188 = vmatpush1.bf16.msra.mxu1 %v2252_v41  ;;  %1148 = vmatprep.subr.bf16.mxu0 %v2253_v42  ;;  %v2346_v41 = vld [vmem:[%s2589_s15 + $0x30c] ss:$16 sps:$4 sm:$0xff]   ;;  %v2341_v42 = vld [vmem:[%s2589_s15 + $0x108] ss:$16 sps:$4 sm:$0xff]  }
  0x41   : > { %1189 = vmatprep.subr.bf16.mxu1 %v2255_v43  ;;  %v2344_v43 = vld [vmem:[%s2589_s15 + $0x308] ss:$16 sps:$4 sm:$0xff]  }
  0x43   : > { %1149 = vmatpush1.bf16.msra.mxu0 %v2257_v44  ;;  %v2349_v44 = vld [vmem:[%s2589_s15 + $0x12c] ss:$16 sps:$4 sm:$0xff]  }
  0x44   : > { %1190 = vmatpush1.bf16.msra.mxu1 %v2258_v45  ;;  %1150 = vmatprep.subr.bf16.mxu0 %v2259_v46  ;;  %v2352_v45 = vld [vmem:[%s2589_s15 + $0x32c] ss:$16 sps:$4 sm:$0xff]   ;;  %v2347_v46 = vld [vmem:[%s2589_s15 + $0x128] ss:$16 sps:$4 sm:$0xff]  }
  0x45   : > { %1191 = vmatprep.subr.bf16.mxu1 %v2261_v47  ;;  %v2350_v47 = vld [vmem:[%s2589_s15 + $0x328] ss:$16 sps:$4 sm:$0xff]  }
  0x47   : > { %1151 = vmatpush1.bf16.msra.mxu0 %v2263_v51  ;;  %v2356_v51 = vld [vmem:[%s2589_s15 + $0x348] ss:$16 sps:$4 sm:$0xff]  }
  0x48   : > { %1192 = vmatpush1.bf16.msra.mxu1 %v2264_v52  ;;  %1152 = vmatprep.subr.bf16.mxu0 %v2265_v54  ;;  %v2361_v52 = vld [vmem:[%s2589_s15 + $0x16c] ss:$16 sps:$4 sm:$0xff]   ;;  %v2359_v54 = vld [vmem:[%s2589_s15 + $0x168] ss:$16 sps:$4 sm:$0xff]  }
  0x49   : > { %1193 = vmatprep.subr.bf16.mxu1 %v2267_v55  ;;  %v2362_v55 = vld [vmem:[%s2589_s15 + $0x368] ss:$16 sps:$4 sm:$0xff]  }
  0x4b   : > { %1153 = vmatpush1.bf16.msra.mxu0 %v2269_v56  ;;  %v2367_v56 = vld [vmem:[%s2589_s15 + $0x18c] ss:$16 sps:$4 sm:$0xff]  }
  0x4c   : > { %1194 = vmatpush1.bf16.msra.mxu1 %v2270_v57  ;;  %1154 = vmatprep.subr.bf16.mxu0 %v2271_v58  ;;  %v2370_v57 = vld [vmem:[%s2589_s15 + $0x38c] ss:$16 sps:$4 sm:$0xff]   ;;  %v2365_v58 = vld [vmem:[%s2589_s15 + $0x188] ss:$16 sps:$4 sm:$0xff]  }
  0x4d   : > { %1195 = vmatprep.subr.bf16.mxu1 %v2273_v59  ;;  %v2368_v59 = vld [vmem:[%s2589_s15 + $0x388] ss:$16 sps:$4 sm:$0xff]  }
  0x4f   : > { %1155 = vmatpush1.bf16.msra.mxu0 %v2275_v60  ;;  %v2373_v60 = vld [vmem:[%s2589_s15 + $0x1ac] ss:$16 sps:$4 sm:$0xff]  }
  0x50   : > { %1196 = vmatpush1.bf16.msra.mxu1 %v2276_v61  ;;  %1156 = vmatprep.subr.bf16.mxu0 %v2277_v62  ;;  %v2376_v61 = vld [vmem:[%s2589_s15 + $0x3ac] ss:$16 sps:$4 sm:$0xff]   ;;  %v2371_v62 = vld [vmem:[%s2589_s15 + $0x1a8] ss:$16 sps:$4 sm:$0xff]  }
  0x51   : > { %1197 = vmatprep.subr.bf16.mxu1 %v2279_v63  ;;  %v2374_v63 = vld [vmem:[%s2589_s15 + $0x3a8] ss:$16 sps:$4 sm:$0xff]  }
  0x53   : > { %1157 = vmatpush1.bf16.msra.mxu0 %v2281_v0  ;;  %v2379_v0 = vld [vmem:[%s2589_s15 + $0x1cc] ss:$16 sps:$4 sm:$0xff]  }
  0x54   : > { %1198 = vmatpush1.bf16.msra.mxu1 %v2282_v1  ;;  %1158 = vmatprep.subr.bf16.mxu0 %v2283_v2  ;;  %v2382_v1 = vld [vmem:[%s2589_s15 + $0x3cc] ss:$16 sps:$4 sm:$0xff]   ;;  %v2377_v2 = vld [vmem:[%s2589_s15 + $0x1c8] ss:$16 sps:$4 sm:$0xff]  }
  0x55   : > { %1199 = vmatprep.subr.bf16.mxu1 %v2285_v3  ;;  %v2380_v3 = vld [vmem:[%s2589_s15 + $0x3c8] ss:$16 sps:$4 sm:$0xff]  }
  0x57   : > { %1159 = vmatpush1.bf16.msra.mxu0 %v2287_v4  ;;  %v2385_v4 = vld [vmem:[%s2589_s15 + $0x1ec] ss:$16 sps:$4 sm:$0xff]  }
  0x58   : > { %1200 = vmatpush1.bf16.msra.mxu1 %v2288_v5  ;;  %1210 = vmatprep.subr.bf16.mxu0 %v2295_v6  ;;  %v2388_v5 = vld [vmem:[%s2589_s15 + $0x3ec] ss:$16 sps:$4 sm:$0xff]   ;;  %v2383_v6 = vld [vmem:[%s2589_s15 + $0x1e8] ss:$16 sps:$4 sm:$0xff]  }
  0x59   : > { %1251 = vmatprep.subr.bf16.mxu1 %v2298_v7  ;;  %v2386_v7 = vld [vmem:[%s2589_s15 + $0x3e8] ss:$16 sps:$4 sm:$0xff]  }
  0x5a   : > { %1161 = vmatmul.mubr.bf16.vlgmr.msra.gmra.mrb[0].mxu0 %v2663_v8 }
  0x5b   : > { %1202 = vmatmul.mubr.bf16.vlgmr.msra.gmra.mrb[0].mxu1 %v2665_v9  ;;  %1211 = vmatpush1.bf16.msra.mxu0 %v2293_v10 }
  0x5c   : > { %1252 = vmatpush1.bf16.msra.mxu1 %v2296_v11  ;;  %1212 = vmatprep.subr.bf16.mxu0 %v2301_v12  ;;  %v340_v11 = vld [vmem:[#allocation2] sm:$0xff] }
  0x5d   : > { %1253 = vmatprep.subr.bf16.mxu1 %v2304_v13  ;;  %1242 = vmatprep.mubr.bf16.mxu0 %v2639_v49  ;;  %v2358_v49 = vld [vmem:[%s2589_s15 + $0x34c] ss:$16 sps:$4 sm:$0xff]  }
  0x5e   : > { %1283 = vmatprep.mubr.bf16.mxu1 %v1964_v53  ;;  %v2364_v53 = vld [vmem:[%s2589_s15 + $0x36c] ss:$16 sps:$4 sm:$0xff]  }
  0x5f   : > { %1213 = vmatpush1.bf16.msra.mxu0 %v2299_v14 }
  0x60   : > { %1254 = vmatpush1.bf16.msra.mxu1 %v2302_v15  ;;  %1214 = vmatprep.subr.bf16.mxu0 %v2307_v16  ;;  %v341_v15 = vld [vmem:[#allocation2 + $0x8] sm:$0xff] }
  0x61   : > { %1255 = vmatprep.subr.bf16.mxu1 %v2310_v17 }
  0x63   : > { %1215 = vmatpush1.bf16.msra.mxu0 %v2305_v18 }
  0x64   : > { %1256 = vmatpush1.bf16.msra.mxu1 %v2308_v19  ;;  %1216 = vmatprep.subr.bf16.mxu0 %v2313_v20 }
  0x65   : > { %1257 = vmatprep.subr.bf16.mxu1 %v2316_v21 }
  0x67   : > { %1217 = vmatpush1.bf16.msra.mxu0 %v2311_v22 }
  0x68   : > { %1258 = vmatpush1.bf16.msra.mxu1 %v2314_v23  ;;  %1218 = vmatprep.subr.bf16.mxu0 %v2319_v24 }
  0x69   : > { %1259 = vmatprep.subr.bf16.mxu1 %v2322_v25 }
  0x6b   : > { %1219 = vmatpush1.bf16.msra.mxu0 %v2317_v26 }
  0x6c   : > { %1260 = vmatpush1.bf16.msra.mxu1 %v2320_v27  ;;  %1220 = vmatprep.subr.bf16.mxu0 %v2325_v28  ;;  %v343_v27 = vld [vmem:[#allocation2 + $0x18] sm:$0xff] }
  0x6d   : > { %1261 = vmatprep.subr.bf16.mxu1 %v2328_v29 }
  0x6f   : > { %1221 = vmatpush1.bf16.msra.mxu0 %v2323_v30 }
  0x70   : > { %1262 = vmatpush1.bf16.msra.mxu1 %v2326_v31  ;;  %1222 = vmatprep.subr.bf16.mxu0 %v2331_v32 }
  0x71   : > { %1263 = vmatprep.subr.bf16.mxu1 %v2334_v33 }
  0x73   : > { %1223 = vmatpush1.bf16.msra.mxu0 %v2329_v34 }
  0x74   : > { %1264 = vmatpush1.bf16.msra.mxu1 %v2332_v35  ;;  %1224 = vmatprep.subr.bf16.mxu0 %v2337_v36  ;;  %v2390_v36 = vld [vmem:[%s2961_s3 + $0x4] ss:$8 sps:$4 sm:$0xff] (!%p2093_p7)  }
  0x75   : > { %1265 = vmatprep.subr.bf16.mxu1 %v2340_v37  ;;  %v2392_v37 = vld [vmem:[%s2961_s3 + $0x104] ss:$8 sps:$4 sm:$0xff] (!%p2093_p7)  }
  0x77   : > { %1225 = vmatpush1.bf16.msra.mxu0 %v2335_v38  ;;  %v2394_v38 = vld [vmem:[%s2961_s3] ss:$8 sps:$4 sm:$0xff] (!%p2093_p7)  }
  0x78   : > { %1266 = vmatpush1.bf16.msra.mxu1 %v2338_v39  ;;  %1226 = vmatprep.subr.bf16.mxu0 %v2343_v40  ;;  %v2395_v39 = vld [vmem:[%s2961_s3 + $0x100] ss:$8 sps:$4 sm:$0xff] (!%p2093_p7)   ;;  %v2396_v40 = vld [vmem:[%s2961_s3 + $0x14] ss:$8 sps:$4 sm:$0xff] (!%p2093_p7)  }
  0x79   : > { %1267 = vmatprep.subr.bf16.mxu1 %v2346_v41  ;;  %v2398_v41 = vld [vmem:[%s2961_s3 + $0x114] ss:$8 sps:$4 sm:$0xff] (!%p2093_p7)  }
  0x7b   : > { %1227 = vmatpush1.bf16.msra.mxu0 %v2341_v42  ;;  %v2400_v42 = vld [vmem:[%s2961_s3 + $0x10] ss:$8 sps:$4 sm:$0xff] (!%p2093_p7)  }
  0x7c   : > { %1268 = vmatpush1.bf16.msra.mxu1 %v2344_v43  ;;  %1228 = vmatprep.subr.bf16.mxu0 %v2349_v44  ;;  %v2401_v43 = vld [vmem:[%s2961_s3 + $0x110] ss:$8 sps:$4 sm:$0xff] (!%p2093_p7)   ;;  %v2402_v44 = vld [vmem:[%s2961_s3 + $0x24] ss:$8 sps:$4 sm:$0xff] (!%p2093_p7)  }
  0x7d   : > { %1269 = vmatprep.subr.bf16.mxu1 %v2352_v45  ;;  %v2404_v45 = vld [vmem:[%s2961_s3 + $0x124] ss:$8 sps:$4 sm:$0xff] (!%p2093_p7)  }
  0x7f   : > { %1229 = vmatpush1.bf16.msra.mxu0 %v2347_v46  ;;  %v2406_v46 = vld [vmem:[%s2961_s3 + $0x20] ss:$8 sps:$4 sm:$0xff] (!%p2093_p7)  }
  0x80   : > { %1270 = vmatpush1.bf16.msra.mxu1 %v2350_v47  ;;  %1230 = vmatprep.subr.bf16.mxu0 %v2355_v48  ;;  %v2407_v47 = vld [vmem:[%s2961_s3 + $0x120] ss:$8 sps:$4 sm:$0xff] (!%p2093_p7)   ;;  %v2408_v48 = vld [vmem:[%s2961_s3 + $0x34] ss:$8 sps:$4 sm:$0xff] (!%p2093_p7)  }
  0x81   : > { %1271 = vmatprep.subr.bf16.mxu1 %v2358_v49  ;;  %v2410_v49 = vld [vmem:[%s2961_s3 + $0x134] ss:$8 sps:$4 sm:$0xff] (!%p2093_p7)  }
  0x83   : > { %1231 = vmatpush1.bf16.msra.mxu0 %v2353_v50  ;;  %v2412_v50 = vld [vmem:[%s2961_s3 + $0x30] ss:$8 sps:$4 sm:$0xff] (!%p2093_p7)  }
  0x84   : > { %1272 = vmatpush1.bf16.msra.mxu1 %v2356_v51  ;;  %1232 = vmatprep.subr.bf16.mxu0 %v2361_v52  ;;  %v2413_v51 = vld [vmem:[%s2961_s3 + $0x130] ss:$8 sps:$4 sm:$0xff] (!%p2093_p7)   ;;  %v2414_v52 = vld [vmem:[%s2961_s3 + $0x44] ss:$8 sps:$4 sm:$0xff] (!%p2093_p7)  }
  0x85   : > { %1273 = vmatprep.subr.bf16.mxu1 %v2364_v53  ;;  %v2416_v53 = vld [vmem:[%s2961_s3 + $0x144] ss:$8 sps:$4 sm:$0xff] (!%p2093_p7)  }
  0x87   : > { %1233 = vmatpush1.bf16.msra.mxu0 %v2359_v54  ;;  %v2418_v54 = vld [vmem:[%s2961_s3 + $0x40] ss:$8 sps:$4 sm:$0xff] (!%p2093_p7)  }
  0x88   : > { %1274 = vmatpush1.bf16.msra.mxu1 %v2362_v55  ;;  %1234 = vmatprep.subr.bf16.mxu0 %v2367_v56  ;;  %v2419_v55 = vld [vmem:[%s2961_s3 + $0x140] ss:$8 sps:$4 sm:$0xff] (!%p2093_p7)   ;;  %v2420_v56 = vld [vmem:[%s2961_s3 + $0x54] ss:$8 sps:$4 sm:$0xff] (!%p2093_p7)  }
  0x89   : > { %1275 = vmatprep.subr.bf16.mxu1 %v2370_v57  ;;  %v2422_v57 = vld [vmem:[%s2961_s3 + $0x154] ss:$8 sps:$4 sm:$0xff] (!%p2093_p7)  }
  0x8b   : > { %1235 = vmatpush1.bf16.msra.mxu0 %v2365_v58  ;;  %v2424_v58 = vld [vmem:[%s2961_s3 + $0x50] ss:$8 sps:$4 sm:$0xff] (!%p2093_p7)  }
  0x8c   : > { %1276 = vmatpush1.bf16.msra.mxu1 %v2368_v59  ;;  %1236 = vmatprep.subr.bf16.mxu0 %v2373_v60  ;;  %v2425_v59 = vld [vmem:[%s2961_s3 + $0x150] ss:$8 sps:$4 sm:$0xff] (!%p2093_p7)   ;;  %v2426_v60 = vld [vmem:[%s2961_s3 + $0x64] ss:$8 sps:$4 sm:$0xff] (!%p2093_p7)  }
  0x8d   : > { %1277 = vmatprep.subr.bf16.mxu1 %v2376_v61  ;;  %v2428_v61 = vld [vmem:[%s2961_s3 + $0x164] ss:$8 sps:$4 sm:$0xff] (!%p2093_p7)  }
  0x8f   : > { %1237 = vmatpush1.bf16.msra.mxu0 %v2371_v62  ;;  %v2430_v62 = vld [vmem:[%s2961_s3 + $0x60] ss:$8 sps:$4 sm:$0xff] (!%p2093_p7)  }
  0x90   : > { %1278 = vmatpush1.bf16.msra.mxu1 %v2374_v63  ;;  %1238 = vmatprep.subr.bf16.mxu0 %v2379_v0  ;;  %v2431_v63 = vld [vmem:[%s2961_s3 + $0x160] ss:$8 sps:$4 sm:$0xff] (!%p2093_p7)   ;;  %v2432_v0 = vld [vmem:[%s2961_s3 + $0x74] ss:$8 sps:$4 sm:$0xff] (!%p2093_p7)  }
  0x91   : > { %1279 = vmatprep.subr.bf16.mxu1 %v2382_v1  ;;  %v2434_v1 = vld [vmem:[%s2961_s3 + $0x174] ss:$8 sps:$4 sm:$0xff] (!%p2093_p7)  }
  0x93   : > { %1239 = vmatpush1.bf16.msra.mxu0 %v2377_v2  ;;  %v2436_v2 = vld [vmem:[%s2961_s3 + $0x70] ss:$8 sps:$4 sm:$0xff] (!%p2093_p7)  }
  0x94   : > { %1280 = vmatpush1.bf16.msra.mxu1 %v2380_v3  ;;  %1240 = vmatprep.subr.bf16.mxu0 %v2385_v4  ;;  %v2437_v3 = vld [vmem:[%s2961_s3 + $0x170] ss:$8 sps:$4 sm:$0xff] (!%p2093_p7)   ;;  %v2438_v4 = vld [vmem:[%s2961_s3 + $0x84] ss:$8 sps:$4 sm:$0xff] (!%p2093_p7)  }
  0x95   : > { %1281 = vmatprep.subr.bf16.mxu1 %v2388_v5  ;;  %v2440_v5 = vld [vmem:[%s2961_s3 + $0x184] ss:$8 sps:$4 sm:$0xff] (!%p2093_p7)  }
  0x97   : > { %1241 = vmatpush1.bf16.msra.mxu0 %v2383_v6  ;;  %v2442_v6 = vld [vmem:[%s2961_s3 + $0x80] ss:$8 sps:$4 sm:$0xff] (!%p2093_p7)  }
  0x98   : > { %1282 = vmatpush1.bf16.msra.mxu1 %v2386_v7  ;;  %1787 = vmatprep.subr.bf16.mxu0 (!%p2093_p7), %v2392_v37  ;;  %v2443_v7 = vld [vmem:[%s2961_s3 + $0x180] ss:$8 sps:$4 sm:$0xff] (!%p2093_p7)   ;;  %v2468_v37 = vld [vmem:[%s2961_s3 + $0xd4] ss:$8 sps:$4 sm:$0xff] (!%p2093_p7)  }
  0x99   : > { %1746 = vmatprep.subr.bf16.mxu1 (!%p2093_p7), %v2390_v36  ;;  %v2467_v36 = vld [vmem:[%s2961_s3 + $0x1c0] ss:$8 sps:$4 sm:$0xff] (!%p2093_p7)  }
  0x9a   : > { %1243 = vmatmul.mubr.bf16.vlgmr.msra.gmra.mrb[4].mxu0 %v2663_v8  ;;  %v342_v8 = vld [vmem:[#allocation2 + $0x10] sm:$0xff] }
  0x9b   : > { %1284 = vmatmul.mubr.bf16.vlgmr.msra.gmra.mrb[4].mxu1 %v2665_v9  ;;  %1788 = vmatpush1.bf16.msra.mxu0 (!%p2093_p7), %v2395_v39 }
  0x9c   : > { %1747 = vmatpush1.bf16.msra.mxu1 (!%p2093_p7), %v2394_v38  ;;  %1789 = vmatprep.subr.bf16.mxu0 (!%p2093_p7), %v2398_v41 }
  0x9d   : > { %1748 = vmatprep.subr.bf16.mxu1 (!%p2093_p7), %v2396_v40 }
  0x9f   : > { %1790 = vmatpush1.bf16.msra.mxu0 (!%p2093_p7), %v2401_v43 }
  0xa0   : > { %1749 = vmatpush1.bf16.msra.mxu1 (!%p2093_p7), %v2400_v42  ;;  %1791 = vmatprep.subr.bf16.mxu0 (!%p2093_p7), %v2404_v45  ;;  %v2470_v42 = vld [vmem:[%s2961_s3 + $0x1d4] ss:$8 sps:$4 sm:$0xff] (!%p2093_p7)  }
  0xa1   : > { %1750 = vmatprep.subr.bf16.mxu1 (!%p2093_p7), %v2402_v44 }
  0xa3   : > { %1792 = vmatpush1.bf16.msra.mxu0 (!%p2093_p7), %v2407_v47 }
  0xa4   : > { %1751 = vmatpush1.bf16.msra.mxu1 (!%p2093_p7), %v2406_v46  ;;  %1793 = vmatprep.subr.bf16.mxu0 (!%p2093_p7), %v2410_v49  ;;  %v2472_v49 = vld [vmem:[%s2961_s3 + $0xd0] ss:$8 sps:$4 sm:$0xff] (!%p2093_p7)  }
  0xa5   : > { %1752 = vmatprep.subr.bf16.mxu1 (!%p2093_p7), %v2408_v48 }
  0xa7   : > { %1794 = vmatpush1.bf16.msra.mxu0 (!%p2093_p7), %v2413_v51 }
  0xa8   : > { %1753 = vmatpush1.bf16.msra.mxu1 (!%p2093_p7), %v2412_v50  ;;  %1795 = vmatprep.subr.bf16.mxu0 (!%p2093_p7), %v2416_v53  ;;  %v2473_v50 = vld [vmem:[%s2961_s3 + $0x1d0] ss:$8 sps:$4 sm:$0xff] (!%p2093_p7)   ;;  %v2474_v53 = vld [vmem:[%s2961_s3 + $0xe4] ss:$8 sps:$4 sm:$0xff] (!%p2093_p7)  }
  0xa9   : > { %1754 = vmatprep.subr.bf16.mxu1 (!%p2093_p7), %v2414_v52 }
  0xab   : > { %1796 = vmatpush1.bf16.msra.mxu0 (!%p2093_p7), %v2419_v55  ;;  %v2478_v55 = vld [vmem:[%s2961_s3 + $0xe0] ss:$8 sps:$4 sm:$0xff] (!%p2093_p7)  }
  0xac   : > { %1755 = vmatpush1.bf16.msra.mxu1 (!%p2093_p7), %v2418_v54  ;;  %1797 = vmatprep.subr.bf16.mxu0 (!%p2093_p7), %v2422_v57  ;;  %v2476_v54 = vld [vmem:[%s2961_s3 + $0x1e4] ss:$8 sps:$4 sm:$0xff] (!%p2093_p7)  }
  0xad   : > { %1756 = vmatprep.subr.bf16.mxu1 (!%p2093_p7), %v2420_v56  ;;  %v2479_v56 = vld [vmem:[%s2961_s3 + $0x1e0] ss:$8 sps:$4 sm:$0xff] (!%p2093_p7)  }
  0xaf   : > { %1798 = vmatpush1.bf16.msra.mxu0 (!%p2093_p7), %v2425_v59  ;;  %v2480_v59 = vld [vmem:[%s2961_s3 + $0xf4] ss:$8 sps:$4 sm:$0xff] (!%p2093_p7)  }
  0xb0   : > { %1757 = vmatpush1.bf16.msra.mxu1 (!%p2093_p7), %v2424_v58  ;;  %1799 = vmatprep.subr.bf16.mxu0 (!%p2093_p7), %v2428_v61  ;;  %v2484_v61 = vld [vmem:[%s2961_s3 + $0xf0] ss:$8 sps:$4 sm:$0xff] (!%p2093_p7)  }
  0xb1   : > { %1758 = vmatprep.subr.bf16.mxu1 (!%p2093_p7), %v2426_v60  ;;  %v2482_v60 = vld [vmem:[%s2961_s3 + $0x1f4] ss:$8 sps:$4 sm:$0xff] (!%p2093_p7)  }
  0xb3   : > { %1800 = vmatpush1.bf16.msra.mxu0 (!%p2093_p7), %v2431_v63 }
  0xb4   : > { %1759 = vmatpush1.bf16.msra.mxu1 (!%p2093_p7), %v2430_v62  ;;  %1801 = vmatprep.subr.bf16.mxu0 (!%p2093_p7), %v2434_v1  ;;  %v2485_v62 = vld [vmem:[%s2961_s3 + $0x1f0] ss:$8 sps:$4 sm:$0xff] (!%p2093_p7)  }
  0xb5   : > { %1760 = vmatprep.subr.bf16.mxu1 (!%p2093_p7), %v2432_v0 }
  0xb7   : > { %1802 = vmatpush1.bf16.msra.mxu0 (!%p2093_p7), %v2437_v3  ;;  %v1414_v3 = vld [vmem:[%s2962_s4] sm:$0x3] (!%p2093_p7) }
  0xb8   : > { %1761 = vmatpush1.bf16.msra.mxu1 (!%p2093_p7), %v2436_v2  ;;  %1803 = vmatprep.subr.bf16.mxu0 (!%p2093_p7), %v2440_v5 }
  0xb9   : > { %1762 = vmatprep.subr.bf16.mxu1 (!%p2093_p7), %v2438_v4 }
  0xbb   : > { %1804 = vmatpush1.bf16.msra.mxu0 (!%p2093_p7), %v2443_v7 }
  0xbc   : > { %1763 = vmatpush1.bf16.msra.mxu1 (!%p2093_p7), %v2442_v6 }
 0x12d   : > { %v1162_v10 = vpop.f32.mrb[0].mxu0 }
 0x12e   : > { %v1203_v12 = vpop.f32.mrb[0].mxu1  ;;  %v1164_v14 = vpop.f32.mrb[1].mxu0 }
 0x12f   : > { %v1204_v13 = vadd.f32 %v1203_v12, %v1162_v10  ;;  %v1205_v16 = vpop.f32.mrb[1].mxu1  ;;  %v1166_v18 = vpop.f32.mrb[2].mxu0  ;;  %v2444_v10 = vld [vmem:[%s2961_s3 + $0x94] ss:$8 sps:$4 sm:$0xff] (!%p2093_p7)  }
 0x130   : > { %v1206_v17 = vadd.f32 %v1205_v16, %v1164_v14  ;;  %v1207_v19 = vpop.f32.mrb[2].mxu1  ;;  %v1167_v21 = vpop.f32.mrb[3].mxu0  ;;  %v2446_v12 = vld [vmem:[%s2961_s3 + $0x194] ss:$8 sps:$4 sm:$0xff] (!%p2093_p7)   ;;  %v2449_v14 = vld [vmem:[%s2961_s3 + $0x190] ss:$8 sps:$4 sm:$0xff] (!%p2093_p7)   ;;  %1764 = vmatprep.subr.bf16.mxu1 (!%p2093_p7), %v2444_v10 }
 0x131   : > { %v1292_v20 = vadd.f32 %v1204_v13, %v340_v11  ;;  %v1208_v22 = vpop.f32.mrb[3].mxu1  ;;  %v1310_v11 = vlaneseq (!%p2093_p7)  ;;  %v2448_v13 = vld [vmem:[%s2961_s3 + $0x90] ss:$8 sps:$4 sm:$0xff] (!%p2093_p7)   ;;  %1805 = vmatprep.subr.bf16.mxu0 (!%p2093_p7), %v2446_v12  ;;  %v2454_v18 = vld [vmem:[%s2961_s3 + $0xa0] ss:$8 sps:$4 sm:$0xff] (!%p2093_p7)  }
 0x132   : > { %v1293_v23 = vadd.f32 %v1206_v17, %v341_v15  ;;  %v2450_v15 = vld [vmem:[%s2961_s3 + $0xa4] ss:$8 sps:$4 sm:$0xff] (!%p2093_p7)   ;;  %v2455_v19 = vld [vmem:[%s2961_s3 + $0x1a0] ss:$8 sps:$4 sm:$0xff] (!%p2093_p7)   ;;  %1765 = vmatpush1.bf16.msra.mxu1 (!%p2093_p7), %v2448_v13  ;;  %1806 = vmatpush1.bf16.msra.mxu0 (!%p2093_p7), %v2449_v14 }
 0x133   : > { %1296 = vst [vmem:[#allocation2] sm:$0xff] %v1292_v20  ;;  %v1311_v16 = vshrl.u32 (!%p2093_p7), %v1310_v11, 7  ;;  %v2452_v17 = vld [vmem:[%s2961_s3 + $0x1a4] ss:$8 sps:$4 sm:$0xff] (!%p2093_p7)   ;;  %v2456_v20 = vld [vmem:[%s2961_s3 + $0xb4] ss:$8 sps:$4 sm:$0xff] (!%p2093_p7)   ;;  %1766 = vmatprep.subr.bf16.mxu1 (!%p2093_p7), %v2450_v15 }
 0x134   : > { %1297 = vst [vmem:[#allocation2 + $0x8] sm:$0xff] %v1293_v23  ;;  %1807 = vmatprep.subr.bf16.mxu0 (!%p2093_p7), %v2452_v17  ;;  %v2458_v23 = vld [vmem:[%s2961_s3 + $0x1b4] ss:$8 sps:$4 sm:$0xff] (!%p2093_p7)   ;;  %v1834_v13 = vld [vmem:[%s2963_s5] sm:$0x3] (!%p2093_p7) }
 0x135   : > { %v2870_v21 = vsub.s32 (!%p2093_p7), 1, %v1311_v16  ;;  %v1324_v22 = vsub.s32 (!%p2093_p7), 3, %v1311_v16 }
 0x136   : > { %1767 = vmatpush1.bf16.msra.mxu1 (!%p2093_p7), %v2454_v18  ;;  %1808 = vmatpush1.bf16.msra.mxu0 (!%p2093_p7), %v2455_v19 }
 0x137   : > { %1768 = vmatprep.subr.bf16.mxu1 (!%p2093_p7), %v2456_v20  ;;  %1809 = vmatprep.subr.bf16.mxu0 (!%p2093_p7), %v2458_v23  ;;  %v1423_v5 = vrot.slane (!%p2093_p7), %v1414_v3, %v2870_v21 }
 0x13a   : > { %v1304_v43 = vld [vmem:[#allocation2] sm:$0xff] (!%p2093_p7) }
 0x16d   : > { %v1244_v24 = vpop.f32.mrb[4].mxu0 }
 0x16e   : > { %v1285_v25 = vpop.f32.mrb[4].mxu1  ;;  %v1246_v26 = vpop.f32.mrb[5].mxu0  ;;  %1303 = sbr.rel (%p2093_p7) target bundleno = 920 (0x398), region = 56 }
 0x16f   : > { %v1286_v9 = vadd.f32 %v1285_v25, %v1244_v24  ;;  %v1287_v28 = vpop.f32.mrb[5].mxu1  ;;  %v1248_v30 = vpop.f32.mrb[6].mxu0  ;;  %v1305_v24 = vld [vmem:[#allocation2 + $0x8] sm:$0xff] (!%p2093_p7) }
 0x170   : > { %v1288_v29 = vadd.f32 %v1287_v28, %v1246_v26  ;;  %v1289_v31 = vpop.f32.mrb[6].mxu1  ;;  %v1249_v33 = vpop.f32.mrb[7].mxu0  ;;  %v1320_v26 = vsub.s32 (!%p2093_p7), 2, %v1311_v16  ;;  %v2461_v28 = vld [vmem:[%s2961_s3 + $0x1b0] ss:$8 sps:$4 sm:$0xff] (!%p2093_p7)  }
 0x171   : > { %v1294_v32 = vadd.f32 %v1286_v9, %v342_v8  ;;  %v1290_v34 = vpop.f32.mrb[7].mxu1  ;;  %v1308_v8 = vld [vmem:[%s2960_s2] sm:$0xf] (!%p2093_p7)  ;;  %v2878_v9 = vsub.s32 (!%p2093_p7), 0, %v1311_v16  ;;  %v2462_v31 = vld [vmem:[%s2961_s3 + $0xc4] ss:$8 sps:$4 sm:$0xff] (!%p2093_p7)   ;;  %1810 = vmatpush1.bf16.msra.mxu0 (!%p2093_p7), %v2461_v28 }
 0x172   : > { %v1295_v35 = vadd.f32 %v1288_v29, %v343_v27  ;;  %v2460_v27 = vld [vmem:[%s2961_s3 + $0xb0] ss:$8 sps:$4 sm:$0xff] (!%p2093_p7)   ;;  %v1317_v29 = vrot.slane (!%p2093_p7), %v1308_v8, %v2870_v21  ;;  %v1325_v30 = vrot.slane (!%p2093_p7), %v1308_v8, %v1324_v22  ;;  %v1321_v39 = vrot.slane (!%p2093_p7), %v1308_v8, %v1320_v26 }
 0x173   : > { %1298 = vst [vmem:[#allocation2 + $0x10] sm:$0xff] %v1294_v32  ;;  %v2464_v32 = vld [vmem:[%s2961_s3 + $0x1c4] ss:$8 sps:$4 sm:$0xff] (!%p2093_p7)   ;;  %v1313_v38 = vrot.slane (!%p2093_p7), %v1308_v8, %v2878_v9  ;;  %1769 = vmatpush1.bf16.msra.mxu1 (!%p2093_p7), %v2460_v27  ;;  %v1419_v4 = vrot.slane (!%p2093_p7), %v1414_v3, %v2878_v9  ;;  %v1839_v22 = vrot.slane (!%p2093_p7), %v1834_v13, %v2878_v9 }
 0x174   : > { %1299 = vst [vmem:[#allocation2 + $0x18] sm:$0xff] %v1295_v35  ;;  %v1331_v33 = vadd.f32 (!%p2093_p7), %v1317_v29, %v1305_v24  ;;  %v2466_v35 = vld [vmem:[%s2961_s3 + $0xc0] ss:$8 sps:$4 sm:$0xff] (!%p2093_p7)   ;;  %1770 = vmatprep.subr.bf16.mxu1 (!%p2093_p7), %v2462_v31  ;;  %1811 = vmatprep.subr.bf16.mxu0 (!%p2093_p7), %v2464_v32  ;;  %v1843_v24 = vrot.slane (!%p2093_p7), %v1834_v13, %v2870_v21 }
 0x175   : > { %1812 = vmatpush1.bf16.msra.mxu0 %v2467_v36  ;;  %v1330_v51 = vadd.f32 %v1313_v38, %v1304_v43  ;;  %v2158_v31 = vld [vmem:[#allocation3] ss:$0 sm:$0xff] }
 0x176   : > { %vm1335_vm0 = vcmp.gt.f32.partialorder %v1331_v33, 0.0  ;;  %v1339_v40 = vmul.f32 0.2, %v1331_v33  ;;  %1813 = vmatprep.subr.bf16.mxu0 %v2470_v42 }
 0x177   : > { %1771 = vmatpush1.bf16.msra.mxu1 %v2466_v35  ;;  %v1338_v57 = vmul.f32 0.2, %v1330_v51  ;;  %vm1334_vm2 = vcmp.gt.f32.partialorder %v1330_v51, 0.0 }
 0x178   : > { %v1343_v45 = vsel %vm1335_vm0, %v1331_v33, %v1339_v40  ;;  %1772 = vmatprep.subr.bf16.mxu1 %v2468_v37 }
 0x179   : > { %v1347_v47 = vpack.c.bf16 %v1343_v45, %v1343_v45  ;;  %1814 = vmatpush1.bf16.msra.mxu0 %v2473_v50  ;;  %v1342_v63 = vsel %vm1334_vm2, %v1330_v51, %v1338_v57 }
 0x17a   : > { %v1306_v44 = vld [vmem:[#allocation2 + $0x10] sm:$0xff]  ;;  %1815 = vmatprep.subr.bf16.mxu0 %v2476_v54  ;;  %v1346_v1 = vpack.c.bf16 %v1342_v63, %v1342_v63 }
 0x17b   : > { %v1307_v25 = vld [vmem:[#allocation2 + $0x18] sm:$0xff]  ;;  %v1332_v52 = vadd.f32 %v1321_v39, %v1306_v44  ;;  %1778 = vmatprep.mubr.bf16.mxu1 %v1347_v47  ;;  %1773 = vmatpush1.bf16.msra.mxu1 %v2472_v49 }
 0x17c   : > { %v1333_v34 = vadd.f32 %v1325_v30, %v1307_v25  ;;  %1774 = vmatprep.subr.bf16.mxu1 %v2474_v53  ;;  %v2515_v30 = vmov 0  }
 0x17d   : > { %v1340_v58 = vmul.f32 0.2, %v1332_v52  ;;  %vm1336_vm3 = vcmp.gt.f32.partialorder %v1332_v52, 0.0  ;;  %1816 = vmatpush1.bf16.msra.mxu0 %v2479_v56  ;;  %2389 = vset.pattern.permute.xlu0 %v2515_v30 }
 0x17e   : > { %vm1337_vm1 = vcmp.gt.f32.partialorder %v1333_v34, 0.0  ;;  %v1341_v41 = vmul.f32 0.2, %v1333_v34  ;;  %1817 = vmatprep.subr.bf16.mxu0 %v2482_v60 }
 0x17f   : > { %1775 = vmatpush1.bf16.msra.mxu1 %v2478_v55  ;;  %v1344_v0 = vsel %vm1336_vm3, %v1332_v52, %v1340_v58 }
 0x180   : > { %v1345_v46 = vsel %vm1337_vm1, %v1333_v34, %v1341_v41  ;;  %1776 = vmatprep.subr.bf16.mxu1 %v2480_v59  ;;  %v1348_v2 = vpack.c.bf16 %v1344_v0, %v1344_v0 }
 0x181   : > { %v1349_v48 = vpack.c.bf16 %v1345_v46, %v1345_v46  ;;  %1818 = vmatpush1.bf16.msra.mxu0 %v2485_v62 }
 0x183   : > { %1819 = vmatprep.mubr.bf16.mxu0 %v1349_v48  ;;  %1777 = vmatpush1.bf16.msra.mxu1 %v2484_v61 }
 0x184   : > { %1820 = vmatmul.mubr.bf16.vlgmr.msra.gmra.mrb[0].mxu0 %v1348_v2 }
 0x186   : > { %1779 = vmatmul.mubr.bf16.vlgmr.msra.gmra.mrb[0].mxu1 %v1346_v1 }
 0x257   : > { %v1821_v7 = vpop.f32.mrb[0].mxu0 }
 0x258   : > { %v1823_v12 = vpop.f32.mrb[1].mxu0 }
 0x259   : > { %v1780_v6 = vpop.f32.mrb[0].mxu1  ;;  %v1825_v16 = vpop.f32.mrb[2].mxu0 }
 0x25a   : > { %v1781_v10 = vadd.f32 %v1780_v6, %v1419_v4  ;;  %v1782_v11 = vpop.f32.mrb[1].mxu1  ;;  %v1826_v19 = vpop.f32.mrb[3].mxu0 }
 0x25b   : > { %v1783_v14 = vadd.f32 %v1782_v11, %v1423_v5  ;;  %v1784_v15 = vpop.f32.mrb[2].mxu1 }
 0x25c   : > { %v1822_v17 = vadd.f32 %v1821_v7, %v1781_v10  ;;  %v1785_v18 = vpop.f32.mrb[3].mxu1 }
 0x25d   : > { %v1824_v20 = vadd.f32 %v1823_v12, %v1783_v14 }
 0x25e   : > { %vm1828_vm4 = vcmp.gt.f32.partialorder %v1822_v17, 0.0  ;;  %v1830_v23 = vmul.f32 0.2, %v1822_v17 }
 0x25f   : > { %vm1829_vm5 = vcmp.gt.f32.partialorder %v1824_v20, 0.0  ;;  %v1831_v8 = vmul.f32 0.2, %v1824_v20 }
 0x260   : > { %v1832_v25 = vsel %vm1828_vm4, %v1822_v17, %v1830_v23 }
 0x261   : > { %v1833_v26 = vsel %vm1829_vm5, %v1824_v20, %v1831_v8  ;;  %v1846_v27 = vmul.f32 %v1839_v22, %v1832_v25 }
 0x262   : > { %v1847_v28 = vmul.f32 %v1843_v24, %v1833_v26 }
 0x264   : > { %v1848_v29 = vadd.f32 %v1847_v28, %v1846_v27 }
 0x266   : > { %1849 = vadd.xlane.f32.xlu0 %v1848_v29 }
 0x2f3   : > { %v1850_v32 = vpop.xlane.xlu0 %1849 }
 0x2f4   : > { %v1858_v33 = vadd.f32 %v2158_v31, %v1850_v32 }
 0x2f6   : > { %v1859_v34 = vand.u32 2147483647, %v1858_v33  ;;  %vm1865_vm6 = vcmp.ge.f32.partialorder %v1858_v33, 0.0 }
 0x2f8   : > { %v1860_v35 = vsub.f32 0.0, %v1859_v34 }
 0x2fa   : > { %v1861_v9 = vmul.f32 1.442695, %v1860_v35 }
 0x2fc   : > { %2486 = vpow2.f32 %v1861_v9 }
 0x306   : > { %v2487_v36 = vpop.eup %2486 }
 0x307   : > { %v1863_v37 = vadd.f32 1.0, %v2487_v36 }
 0x309   : > { %2488 = vrcp.f32 %v1863_v37 }
 0x313   : > { %v2489_v21 = vpop.eup %2488 }
 0x314   : > { %v1866_v38 = vmul.f32 %v2489_v21, %v2487_v36 }
 0x316   : > { %v1867_v39 = vsel %vm1865_vm6, %v2489_v21, %v1866_v38 }
 0x317   : > { %1870 = vperm.xlu0 %2389, %v1867_v39  }
 0x396   : > { %v1871_v40 = vpop.permute.xlu0 %1870 }
 0x397   : > { %1873 = vst [vmem:[%s2965_s7] sm:$0xff] %v1871_v40 }
 0x398 PF: > { %s19_s28 = sadd.s32 1, %s2512_s28   ;;  %s2966_s26 = smov %s2508_s27 }
 0x399   : > { %p16_p8 = scmp.ge.s32.totalorder %s19_s28, 4   ;;  %s2967_s27 = smov %s2969_s6 }
 0x39b   :  { %18 = sbr.rel (!%p16_p8) target bundleno = 3 (0x3), region = 89 }

</bundles_post_ra>
